<compile_context>
chip_gen: v5e
topology: v5e:2x2
jax: 0.10.0
libtpu: 0.0.40
codegen_flags: <defaults>
</compile_context>

<pallas_src>
import math
from functools import partial

import jax
import jax.numpy as jnp
from jax import lax
from jax.experimental import pallas as pl
from jax.experimental.pallas import tpu as pltpu


OUT_DT = jnp.float32
VMEM_LIMIT = 32 * 1024 * 1024   # safe scoped-VMEM budget on v5e / v6e / v7x
NEG = -1e30                     # finite "-inf" fill (avoids 0*inf / inf-inf NaNs)


def _round_up(n, m):
    return ((n + m - 1) // m) * m


def _row_tile(n_pad, max_tile):
    """Largest allowed row tile, but guarantee >=2 grid steps when possible so
    dimension_semantics=("parallel",) can shard across v7x's two TensorCores."""
    half = _round_up(max(-(-n_pad // 2), 8), 8)
    return min(max_tile, half)


def _path_compiler_params():
    return pltpu.CompilerParams(
        dimension_semantics=("parallel",),    # independent row tiles -> megacore / 2-TC
        vmem_limit_bytes=VMEM_LIMIT,
    )


# --------------------------------------------------------------------------
# Fused path kernels: shared base Linear+ReLU, packed per-head readouts and the
# FFNAtten weights_readout chain, all in VMEM, one lane-packed output.
# --------------------------------------------------------------------------
def _atom_path_kernel(p_heads, x_ref, wb_ref, bb_ref, wr1_ref, br1_ref,
                      w2_ref, b2_ref, o_ref):
    # shared atom base: Linear + ReLU (Dropout == identity at inference)
    hid = jnp.dot(x_ref[...], wb_ref[...], preferred_element_type=jnp.float32) + bb_ref[...]
    hid = jnp.maximum(hid, 0.0)
    # one wide matmul: [all packed head readouts | FFNAtten weights layer 1]
    t = jnp.dot(hid, wr1_ref[...], preferred_element_type=jnp.float32) + br1_ref[...]
    y = t[:, :p_heads]
    wh = jnp.maximum(t[:, p_heads:], 0.0)
    wa = jnp.dot(wh, w2_ref[...], preferred_element_type=jnp.float32) + b2_ref[...]
    # lane-packed single output: [head outputs | W_a]
    o_ref[...] = jnp.concatenate([y, wa], axis=1).astype(o_ref.dtype)


def _bond_path_kernel(p_heads, hdim, out_size, n_bond_heads,
                      f_ref, b_ref, wpk_ref, bb_ref, wr1_ref, br1_ref,
                      w2_ref, b2_ref, bt_ref, o_ref):
    wpk = wpk_ref[...]                       # (F, 2H) = [W_top | W_bot]
    hf = jnp.dot(f_ref[...], wpk, preferred_element_type=jnp.float32)
    hb = jnp.dot(b_ref[...], wpk, preferred_element_type=jnp.float32)
    bb = bb_ref[...]
    # Linear(concat([fwd,bwd])) = fwd@W_top + bwd@W_bot (and the swapped order)
    h1 = jnp.maximum(hf[:, :hdim] + hb[:, hdim:] + bb, 0.0)
    h2 = jnp.maximum(hb[:, :hdim] + hf[:, hdim:] + bb, 0.0)
    hid = 0.5 * (h1 + h2)
    t = jnp.dot(hid, wr1_ref[...], preferred_element_type=jnp.float32) + br1_ref[...]
    # per-head bond-type offsets expanded in-kernel (input is (rows, n_bond_heads))
    bt = bt_ref[...]
    rows = bt.shape[0]
    off = jnp.concatenate(
        [jnp.broadcast_to(bt[:, j:j + 1], (rows, out_size)) for j in range(n_bond_heads)],
        axis=1)
    y = t[:, :p_heads] + off
    wh = jnp.maximum(t[:, p_heads:], 0.0)
    wa = jnp.dot(wh, w2_ref[...], preferred_element_type=jnp.float32) + b2_ref[...]
    o_ref[...] = jnp.concatenate([y, wa], axis=1).astype(o_ref.dtype)


def atom_path_pallas(x, wb, bb, wr1, br1, w2, b2, *, max_tile=4096):
    n, f = x.shape
    h = wb.shape[1]
    pw = wr1.shape[1]            # packed heads width + hidden (weights layer 1)
    p = pw - h
    n_pad = _round_up(n, 8)      # rows padded to a sublane multiple only; grid uses cdiv
    if n_pad != n:
        x = jnp.pad(x, ((0, n_pad - n), (0, 0)))
    tile = _row_tile(n_pad, max_tile)
    rows = lambda i: (i, 0)
    res = lambda i: (0, 0)       # weights/biases stay VMEM-resident across the row grid
    out = pl.pallas_call(
        partial(_atom_path_kernel, p),
        out_shape=jax.ShapeDtypeStruct((n_pad, p + 1), OUT_DT),
        grid=(pl.cdiv(n_pad, tile),),
        in_specs=[
            pl.BlockSpec((tile, f), rows),
            pl.BlockSpec((f, h), res),
            pl.BlockSpec((1, h), res),
            pl.BlockSpec((h, pw), res),
            pl.BlockSpec((1, pw), res),
            pl.BlockSpec((h, 1), res),
            pl.BlockSpec((1, 1), res),
        ],
        out_specs=pl.BlockSpec((tile, p + 1), rows),
        compiler_params=_path_compiler_params(),
    )(x, wb, bb.reshape(1, h), wr1, br1.reshape(1, pw), w2, b2.reshape(1, 1))
    return out[:n, :p], out[:n, p:]


def bond_path_pallas(fwd, bwd, wpk, bb, wr1, br1, w2, b2, bt, out_size, *, max_tile=4096):
    n, f = fwd.shape
    h = bb.shape[0]
    pw = wr1.shape[1]
    p = pw - h
    nbh = bt.shape[1]
    n_pad = _round_up(n, 8)
    if n_pad != n:
        pad = ((0, n_pad - n), (0, 0))
        fwd = jnp.pad(fwd, pad)
        bwd = jnp.pad(bwd, pad)
        bt = jnp.pad(bt, pad)
    tile = _row_tile(n_pad, max_tile)
    rows = lambda i: (i, 0)
    res = lambda i: (0, 0)
    out = pl.pallas_call(
        partial(_bond_path_kernel, p, h, out_size, nbh),
        out_shape=jax.ShapeDtypeStruct((n_pad, p + 1), OUT_DT),
        grid=(pl.cdiv(n_pad, tile),),
        in_specs=[
            pl.BlockSpec((tile, f), rows),
            pl.BlockSpec((tile, f), rows),
            pl.BlockSpec((f, 2 * h), res),
            pl.BlockSpec((1, h), res),
            pl.BlockSpec((h, pw), res),
            pl.BlockSpec((1, pw), res),
            pl.BlockSpec((h, 1), res),
            pl.BlockSpec((1, 1), res),
            pl.BlockSpec((tile, nbh), rows),
        ],
        out_specs=pl.BlockSpec((tile, p + 1), rows),
        compiler_params=_path_compiler_params(),
    )(fwd, bwd, wpk, bb.reshape(1, h), wr1, br1.reshape(1, pw), w2, b2.reshape(1, 1), bt)
    return out[:n, :p], out[:n, p:]


# --------------------------------------------------------------------------
# FFNAtten constrained readout, row-tiled (VMEM = O(tile * M), not O(R * M)):
#   per molecule m: q_f = q + softmax(W_a)[rows of m] * (Q_m - sum(q[rows of m]))
# Grid = (3 phases, row tiles), "arbitrary" so the (8, M) stats scratch
# accumulates sequentially:
#   phase 0: per-molecule max(W_a) and sum(q)
#   phase 1: per-molecule softmax denominator (with the final max)
#   phase 2: apply.  Per-row gathers of the (1, M) stats rows are lane reductions
#            of (single) membership mask * stats — no transposed masks, no N=1 matmuls.
# Padded rows carry seg = -1 so they match no molecule column.
# --------------------------------------------------------------------------
def _constrain_kernel(q_ref, wa_ref, seg_ref, c_ref, o_ref, stats_ref):
    # stats_ref rows: 0 = seg_max, 1 = seg_qsum, 2 = seg_den   (shape (8, M), M on lanes)
    phase = pl.program_id(0)
    first = pl.program_id(1) == 0
    m = c_ref.shape[1]
    q = q_ref[...]            # (T, O)
    wa = wa_ref[...]          # (T, 1)
    seg = seg_ref[...]        # (T, 1) int32; padded rows are -1
    t = q.shape[0]
    mask_b = seg == lax.broadcasted_iota(jnp.int32, (t, m), 1)   # single (T, M) mask
    maskf = mask_b.astype(jnp.float32)

    @pl.when(jnp.logical_and(phase == 0, first))
    def _():
        stats_ref[...] = jnp.zeros_like(stats_ref)
        stats_ref[0:1, :] = jnp.full((1, m), NEG, jnp.float32)

    @pl.when(phase == 0)       # pass 1: per-molecule max(W_a), sum(q)
    def _():
        tile_max = jnp.max(jnp.where(mask_b, wa, NEG), axis=0, keepdims=True)   # (1, M)
        q_row = jnp.sum(q, axis=1, keepdims=True)                               # (T, 1)
        tile_qsum = jnp.sum(maskf * q_row, axis=0, keepdims=True)               # (1, M)
        stats_ref[0:1, :] = jnp.maximum(stats_ref[0:1, :], tile_max)
        stats_ref[1:2, :] = stats_ref[1:2, :] + tile_qsum

    @pl.when(phase == 1)       # pass 2: per-molecule softmax denominator
    def _():
        row_max = jnp.sum(maskf * stats_ref[0:1, :], axis=1, keepdims=True)     # (T, 1)
        e = jnp.exp(wa - row_max)
        stats_ref[2:3, :] = stats_ref[2:3, :] + jnp.sum(maskf * e, axis=0, keepdims=True)

    @pl.when(phase == 2)       # pass 3: q_f = q + softmax(W_a) * (Q - sum(q))
    def _():
        seg_adj = c_ref[...] - stats_ref[1:2, :]                                # (1, M)
        row_max = jnp.sum(maskf * stats_ref[0:1, :], axis=1, keepdims=True)
        row_den = jnp.sum(maskf * stats_ref[2:3, :], axis=1, keepdims=True)
        row_adj = jnp.sum(maskf * seg_adj, axis=1, keepdims=True)
        e = jnp.exp(wa - row_max)
        w = e / jnp.where(row_den > 0.0, row_den, 1.0)   # padded rows stay finite
        o_ref[...] = (q + w * row_adj).astype(o_ref.dtype)


def constrain_pallas(q, wa, seg, constraints, *, max_tile=256):
    r, o = q.shape
    m = int(constraints.shape[0])
    tile = min(max_tile, _round_up(r, 8))
    # rows padded to a tile multiple so padded rows have controlled values (seg = -1)
    r_pad = _round_up(r, tile)
    if r_pad != r:
        pad = r_pad - r
        q = jnp.pad(q, ((0, pad), (0, 0)))
        wa = jnp.pad(wa, ((0, pad), (0, 0)))
        seg = jnp.pad(seg, ((0, pad),), constant_values=-1)
    rows = lambda p, i: (i, 0)
    res = lambda p, i: (0, 0)
    out = pl.pallas_call(
        _constrain_kernel,
        out_shape=jax.ShapeDtypeStruct((r_pad, o), OUT_DT),
        grid=(3, r_pad // tile),        # (phase, row tile); phases iterate slowest
        in_specs=[
            pl.BlockSpec((tile, o), rows),
            pl.BlockSpec((tile, 1), rows),
            pl.BlockSpec((tile, 1), rows),
            pl.BlockSpec((1, m), res),
        ],
        out_specs=pl.BlockSpec((tile, o), rows),
        scratch_shapes=[pltpu.VMEM((8, m), jnp.float32)],
        compiler_params=pltpu.CompilerParams(
            dimension_semantics=("arbitrary", "arbitrary"),  # stats accumulation is sequential
            vmem_limit_bytes=VMEM_LIMIT),
    )(q, wa, seg.reshape(r_pad, 1).astype(jnp.int32),
      constraints.reshape(1, m).astype(jnp.float32))
    return out[:r]


# --------------------------------------------------------------------------
# Parameter init (deterministic, PyTorch-Linear-like uniform bounds)
# --------------------------------------------------------------------------
def init_linear(key, fan_in, fan_out):
    kw, kb = jax.random.split(key)
    bound = 1.0 / math.sqrt(fan_in)
    w = jax.random.uniform(kw, (fan_in, fan_out), jnp.float32, -bound, bound)
    b = jax.random.uniform(kb, (fan_out,), jnp.float32, -bound, bound)
    return w, b


def init_multireadout(key, atom_features, bond_features, atom_hidden, bond_hidden,
                      output_size, atom_constraints, bond_constraints):
    keys = jax.random.split(key, 32)
    params = {
        "output_size": output_size,
        "atom_base": init_linear(keys[0], atom_features, atom_hidden),
        "bond_base": init_linear(keys[1], 2 * bond_features, bond_hidden),
        "heads": [],
    }
    k = 2
    for typ, hidden, cons_list in (("atom", atom_hidden, atom_constraints),
                                   ("bond", bond_hidden, bond_constraints)):
        slot = 0
        for constrained in cons_list:
            head = {"type": typ, "constrained": constrained, "slot": slot,
                    "readout": init_linear(keys[k], hidden, output_size)}
            k += 1
            if constrained:  # FFNAtten weights_readout: Linear -> ReLU -> Linear(., 1)
                head["w1"] = init_linear(keys[k], hidden, hidden); k += 1
                head["w2"] = init_linear(keys[k], hidden, 1); k += 1
            params["heads"].append(head)
            slot += 1

    # ---- packed / split parameter views consumed by the fused Pallas kernels ----
    wb_full, bb_full = params["bond_base"]
    params["bond_base_packed"] = (
        jnp.concatenate([wb_full[:bond_features], wb_full[bond_features:]], axis=1),
        bb_full)                                                   # (F, 2H), (H,)
    for typ in ("atom", "bond"):
        heads_t = [h for h in params["heads"] if h["type"] == typ]
        wr = jnp.concatenate([h["readout"][0] for h in heads_t], axis=1)
        br = jnp.concatenate([h["readout"][1] for h in heads_t], axis=0)
        att = [h for h in heads_t if h["constrained"]]
        assert len(att) == 1   # realized config: exactly one FFNAtten per type
        (w1, b1), (w2, b2) = att[0]["w1"], att[0]["w2"]
        params[f"{typ}_fused"] = {
            # packed head readouts + FFNAtten weights layer 1 => one shared-LHS matmul
            "wr1": jnp.concatenate([wr, w1], axis=1),              # (H, P + H)
            "br1": jnp.concatenate([br, b1], axis=0),              # (P + H,)
            "w2": w2, "b2": b2,
        }
    params["bond_head_indices"] = [i for i, h in enumerate(params["heads"])
                                   if h["type"] == "bond"]
    return params


# --------------------------------------------------------------------------
# MultiReadout forward (fused Pallas compute, JAX glue for ragged gathers)
# --------------------------------------------------------------------------
def multireadout_forward(params, a_hidden, a_scope, b_hidden, b_scope, b2br,
                         constraints_batch, bond_types_batch):
    out_size = params["output_size"]

    # ---- atom path: one fused, row-tiled kernel (base + packed heads + W_a chain)
    wab, bab = params["atom_base"]
    af = params["atom_fused"]
    atom_y, atom_wa = atom_path_pallas(a_hidden, wab, bab, af["wr1"], af["br1"],
                                       af["w2"], af["b2"])

    # ---- bond path
    # TODO(synk): the b2br row gather stays as an XLA gather; for chemprop's paired
    #             directed-bond layout an in-kernel stride-2 row read (or a
    #             scalar-prefetched DMA gather) would remove this HBM round trip.
    fwd = jnp.take(b_hidden, b2br[:, 0], axis=0)
    bwd = jnp.take(b_hidden, b2br[:, 1], axis=0)
    nb = fwd.shape[0]
    # one bond-type column per bond head; expanded to out_size columns in-kernel
    bt_cols = []
    for head_idx in params["bond_head_indices"]:
        bt = bond_types_batch[head_idx]
        bt_cols.append(jnp.zeros((nb,), jnp.float32) if bt is None
                       else bt.astype(jnp.float32))
    bt_packed = jnp.stack(bt_cols, axis=1)                         # (nb, n_bond_heads)

    wpk, bbb = params["bond_base_packed"]
    bf = params["bond_fused"]
    bond_y, bond_wa = bond_path_pallas(fwd, bwd, wpk, bbb, bf["wr1"], bf["br1"],
                                       bf["w2"], bf["b2"], bt_packed, out_size)

    # ---- split packed head outputs, apply per-head post-processing
    results = []
    for head_idx, head in enumerate(params["heads"]):
        typ, constrained, slot = head["type"], head["constrained"], head["slot"]
        if typ == "atom":
            y_all, wa_all, scope = atom_y, atom_wa, a_scope
        else:
            y_all, wa_all = bond_y, bond_wa
            scope = [((s - 1) // 2, n // 2) for s, n in b_scope]
        out = y_all[:, slot * out_size:(slot + 1) * out_size]
        if not constrained:
            results.append(out[1:] if typ == "atom" else out)   # drop padding-atom row
        else:
            rows, segs = [], []
            for m_i, (start, size) in enumerate(scope):  # scope is static python metadata
                if size == 0:
                    continue
                rows.extend(range(start, start + size))
                segs.extend([m_i] * size)
            rows = jnp.asarray(rows, jnp.int32)
            segs = jnp.asarray(segs, jnp.int32)
            # TODO(synk): row gathers for the constrained heads stay in XLA (ragged scope).
            q = jnp.take(out, rows, axis=0)
            wa_rows = jnp.take(wa_all, rows, axis=0)
            results.append(constrain_pallas(q, wa_rows, segs, constraints_batch[head_idx]))
    return results


# --------------------------------------------------------------------------
# Pure-JAX reference (mirrors the PyTorch forward exactly) for validation
# --------------------------------------------------------------------------
def multireadout_reference(params, a_hidden, a_scope, b_hidden, b_scope, b2br,
                           constraints_batch, bond_types_batch):
    hp = jax.lax.Precision.HIGHEST

    def lin(x, w, b, relu=False):
        y = jnp.dot(x, w, precision=hp) + b.reshape(1, -1)
        return jnp.maximum(y, 0.0) if relu else y

    wab, bab = params["atom_base"]
    atom_h = lin(a_hidden, wab, bab, True)
    fwd = b_hidden[b2br[:, 0]]
    bwd = b_hidden[b2br[:, 1]]
    wbb, bbb = params["bond_base"]
    bond_h = 0.5 * (lin(jnp.concatenate([fwd, bwd], 1), wbb, bbb, True)
                    + lin(jnp.concatenate([bwd, fwd], 1), wbb, bbb, True))

    results = []
    for i, head in enumerate(params["heads"]):
        if head["type"] == "atom":
            hidden, scope = atom_h, a_scope
        else:
            hidden = bond_h
            scope = [((s - 1) // 2, n // 2) for s, n in b_scope]
        wr, br = head["readout"]
        out = lin(hidden, wr, br)
        if head["type"] == "bond" and bond_types_batch[i] is not None:
            out = out + bond_types_batch[i].reshape(-1, 1)
        if not head["constrained"]:
            results.append(out[1:] if head["type"] == "atom" else out)
        else:
            w1, b1 = head["w1"]
            w2, b2 = head["w2"]
            wa = lin(lin(hidden, w1, b1, True), w2, b2)
            pieces = []
            for m, (start, size) in enumerate(scope):
                if size == 0:
                    continue
                q_i = out[start:start + size]
                w_i = jax.nn.softmax(wa[start:start + size], axis=0)
                q_m = constraints_batch[i][m]
                pieces.append(q_i + w_i * (q_m - q_i.sum()))
            results.append(jnp.concatenate(pieces, axis=0))
    return results


# --------------------------------------------------------------------------
if __name__ == "__main__":
    key = jax.random.PRNGKey(0)
    k_par, k_a, k_b, k_bt, k_c1, k_c2 = jax.random.split(key, 6)

    ATOM_F, BOND_F, ATOM_H, BOND_H, OUT = 32, 16, 32, 32, 3
    atom_constraints = [False, True]
    bond_constraints = [False, True]

    params = init_multireadout(k_par, ATOM_F, BOND_F, ATOM_H, BOND_H, OUT,
                               atom_constraints, bond_constraints)

    # Two molecules: 4 + 5 atoms (row 0 is the chemprop padding atom),
    # 3 + 2 bonds (row 0 of b_hidden is padding; directed bonds come in pairs).
    a_hidden = jax.random.normal(k_a, (10, ATOM_F), jnp.float32)
    a_scope = [(1, 4), (5, 5)]
    b_hidden = jax.random.normal(k_b, (11, BOND_F), jnp.float32)
    b_scope = [(1, 6), (7, 4)]
    b2br = jnp.array([[1, 2], [3, 4], [5, 6], [7, 8], [9, 10]], jnp.int32)

    bond_types = jax.random.uniform(k_bt, (5,), jnp.float32, 1.0, 3.0)
    c_atom = jax.random.normal(k_c1, (2,), jnp.float32)
    c_bond = jax.random.normal(k_c2, (2,), jnp.float32)

    # ffn_list order: atom FFN, atom FFNAtten, bond FFN, bond FFNAtten
    constraints_batch = [None, c_atom, None, c_bond]
    bond_types_batch = [None, None, bond_types, bond_types]

    outs = multireadout_forward(params, a_hidden, a_scope, b_hidden, b_scope, b2br,
                                constraints_batch, bond_types_batch)
    outs = jax.block_until_ready(outs)

    refs = multireadout_reference(params, a_hidden, a_scope, b_hidden, b_scope, b2br,
                                  constraints_batch, bond_types_batch)
    expected_shapes = [(9, 3), (9, 3), (5, 3), (5, 3)]
    for o, r, s in zip(outs, refs, expected_shapes):
        assert o.shape == s, (o.shape, s)
        # NOTE: kernels use default MXU f32 precision vs. HIGHEST in the reference.
        assert jnp.allclose(o, r, atol=2e-3, rtol=2e-3), float(jnp.abs(o - r).max())

    print("KERNEL_OK")
</pallas_src>

<mosaic_0001>
module attributes {stable_mosaic.version = 11 : i64} {
  func.func @_atom_path_kernel(%arg0: i32, %arg1: memref<8x32xf32, #tpu.memory_space<vmem>>, %arg2: memref<32x32xf32, #tpu.memory_space<vmem>>, %arg3: memref<1x32xf32, #tpu.memory_space<vmem>>, %arg4: memref<32x38xf32, #tpu.memory_space<vmem>>, %arg5: memref<1x38xf32, #tpu.memory_space<vmem>>, %arg6: memref<32x1xf32, #tpu.memory_space<vmem>>, %arg7: memref<1x1xf32, #tpu.memory_space<vmem>>, %arg8: memref<8x7xf32, #tpu.memory_space<vmem>>) attributes {dimension_semantics = [#tpu.dimension_semantics<parallel>], iteration_bounds = array<i64: 2>, scalar_prefetch = 0 : i64, scratch_operands = 0 : i64, tpu.core_type = #tpu.core_type<tc>, window_params = [{transform_indices = @transform_0, window_bounds = array<i64: 8, 32>}, {pipeline_mode = #tpu.pipeline_mode<synchronous>, transform_indices = @transform_1, window_bounds = array<i64: 32, 32>}, {pipeline_mode = #tpu.pipeline_mode<synchronous>, transform_indices = @transform_2, window_bounds = array<i64: 1, 32>}, {pipeline_mode = #tpu.pipeline_mode<synchronous>, transform_indices = @transform_3, window_bounds = array<i64: 32, 38>}, {pipeline_mode = #tpu.pipeline_mode<synchronous>, transform_indices = @transform_4, window_bounds = array<i64: 1, 38>}, {pipeline_mode = #tpu.pipeline_mode<synchronous>, transform_indices = @transform_5, window_bounds = array<i64: 32, 1>}, {pipeline_mode = #tpu.pipeline_mode<synchronous>, transform_indices = @transform_6, window_bounds = array<i64: 1, 1>}, {transform_indices = @transform_7, window_bounds = array<i64: 8, 7>}]} {
    %c0 = arith.constant 0 : index
    %c0_0 = arith.constant 0 : index
    %0 = vector.load %arg1[%c0, %c0_0] : memref<8x32xf32, #tpu.memory_space<vmem>>, vector<8x32xf32>
    %c0_1 = arith.constant 0 : index
    %c0_2 = arith.constant 0 : index
    %1 = vector.load %arg2[%c0_1, %c0_2] : memref<32x32xf32, #tpu.memory_space<vmem>>, vector<32x32xf32>
    %cst = arith.constant dense<0.000000e+00> : vector<8x32xf32>
    %2 = tpu.matmul %0, %1, %cst {dimension_numbers = #tpu.dot_dimension_numbers<[1], [0], [0], [1], [0, 0, 1, 1], [], []>} : vector<8x32xf32>, vector<32x32xf32>, vector<8x32xf32> -> vector<8x32xf32>
    %c0_3 = arith.constant 0 : index
    %c0_4 = arith.constant 0 : index
    %3 = vector.load %arg3[%c0_3, %c0_4] : memref<1x32xf32, #tpu.memory_space<vmem>>, vector<1x32xf32>
    %4 = vector.broadcast %3 : vector<1x32xf32> to vector<8x32xf32>
    %5 = arith.addf %2, %4 : vector<8x32xf32>
    %cst_5 = arith.constant 0.000000e+00 : f32
    %6 = vector.broadcast %cst_5 : f32 to vector<8x32xf32>
    %7 = arith.maximumf %5, %6 : vector<8x32xf32>
    %c0_6 = arith.constant 0 : index
    %c0_7 = arith.constant 0 : index
    %8 = vector.load %arg4[%c0_6, %c0_7] : memref<32x38xf32, #tpu.memory_space<vmem>>, vector<32x38xf32>
    %cst_8 = arith.constant dense<0.000000e+00> : vector<8x38xf32>
    %9 = tpu.matmul %7, %8, %cst_8 {dimension_numbers = #tpu.dot_dimension_numbers<[1], [0], [0], [1], [0, 0, 1, 1], [], []>} : vector<8x32xf32>, vector<32x38xf32>, vector<8x38xf32> -> vector<8x38xf32>
    %c0_9 = arith.constant 0 : index
    %c0_10 = arith.constant 0 : index
    %10 = vector.load %arg5[%c0_9, %c0_10] : memref<1x38xf32, #tpu.memory_space<vmem>>, vector<1x38xf32>
    %11 = vector.broadcast %10 : vector<1x38xf32> to vector<8x38xf32>
    %12 = arith.addf %9, %11 : vector<8x38xf32>
    %13 = vector.extract_strided_slice %12 {offsets = [0, 0], sizes = [8, 6], strides = [1, 1]} : vector<8x38xf32> to vector<8x6xf32>
    %14 = vector.extract_strided_slice %12 {offsets = [0, 6], sizes = [8, 32], strides = [1, 1]} : vector<8x38xf32> to vector<8x32xf32>
    %cst_11 = arith.constant 0.000000e+00 : f32
    %15 = vector.broadcast %cst_11 : f32 to vector<8x32xf32>
    %16 = arith.maximumf %14, %15 : vector<8x32xf32>
    %c0_12 = arith.constant 0 : index
    %c0_13 = arith.constant 0 : index
    %17 = vector.load %arg6[%c0_12, %c0_13] : memref<32x1xf32, #tpu.memory_space<vmem>>, vector<32x1xf32>
    %cst_14 = arith.constant dense<0.000000e+00> : vector<8x1xf32>
    %18 = tpu.matmul %16, %17, %cst_14 {dimension_numbers = #tpu.dot_dimension_numbers<[1], [0], [0], [1], [0, 0, 1, 1], [], []>} : vector<8x32xf32>, vector<32x1xf32>, vector<8x1xf32> -> vector<8x1xf32>
    %c0_15 = arith.constant 0 : index
    %c0_16 = arith.constant 0 : index
    %19 = vector.load %arg7[%c0_15, %c0_16] : memref<1x1xf32, #tpu.memory_space<vmem>>, vector<1x1xf32>
    %20 = vector.broadcast %19 : vector<1x1xf32> to vector<8x1xf32>
    %21 = arith.addf %18, %20 : vector<8x1xf32>
    %22 = tpu.concatenate %13, %21 in 1 : vector<8x6xf32>, vector<8x1xf32> -> vector<8x7xf32>
    %c0_17 = arith.constant 0 : index
    %c0_18 = arith.constant 0 : index
    %23 = vector.load %arg8[%c0_17, %c0_18] : memref<8x7xf32, #tpu.memory_space<vmem>>, vector<8x7xf32>
    tpu.vector_store %arg8[%c0_17, %c0_18], %22 {strides = array<i32>} : memref<8x7xf32, #tpu.memory_space<vmem>>, vector<8x7xf32>,
    return
  }
  func.func @transform_0(%arg0: i32) -> (i32, i32) {
    %c0_i32 = arith.constant 0 : i32
    %c0_i32_0 = arith.constant 0 : i32
    return %arg0, %c0_i32 : i32, i32
  }
  func.func @transform_1(%arg0: i32) -> (i32, i32) {
    %c0_i32 = arith.constant 0 : i32
    %c0_i32_0 = arith.constant 0 : i32
    %c0_i32_1 = arith.constant 0 : i32
    return %c0_i32, %c0_i32_0 : i32, i32
  }
  func.func @transform_2(%arg0: i32) -> (i32, i32) {
    %c0_i32 = arith.constant 0 : i32
    %c0_i32_0 = arith.constant 0 : i32
    %c0_i32_1 = arith.constant 0 : i32
    return %c0_i32, %c0_i32_0 : i32, i32
  }
  func.func @transform_3(%arg0: i32) -> (i32, i32) {
    %c0_i32 = arith.constant 0 : i32
    %c0_i32_0 = arith.constant 0 : i32
    %c0_i32_1 = arith.constant 0 : i32
    return %c0_i32, %c0_i32_0 : i32, i32
  }
  func.func @transform_4(%arg0: i32) -> (i32, i32) {
    %c0_i32 = arith.constant 0 : i32
    %c0_i32_0 = arith.constant 0 : i32
    %c0_i32_1 = arith.constant 0 : i32
    return %c0_i32, %c0_i32_0 : i32, i32
  }
  func.func @transform_5(%arg0: i32) -> (i32, i32) {
    %c0_i32 = arith.constant 0 : i32
    %c0_i32_0 = arith.constant 0 : i32
    %c0_i32_1 = arith.constant 0 : i32
    return %c0_i32, %c0_i32_0 : i32, i32
  }
  func.func @transform_6(%arg0: i32) -> (i32, i32) {
    %c0_i32 = arith.constant 0 : i32
    %c0_i32_0 = arith.constant 0 : i32
    %c0_i32_1 = arith.constant 0 : i32
    return %c0_i32, %c0_i32_0 : i32, i32
  }
  func.func @transform_7(%arg0: i32) -> (i32, i32) {
    %c0_i32 = arith.constant 0 : i32
    %c0_i32_0 = arith.constant 0 : i32
    return %arg0, %c0_i32 : i32, i32
  }
}

</mosaic_0001>

<bundles_post_ra>
// kernel: tpu_custom_call.1
= control target key start
LH: loop header
LB: loop body
LE: loop exit
PB: predicated region body
PF: predicated region fallthrough
CT: control target
= control target key end

     0   :  { %s853_s0 = inlined_call_operand.hbm [shape: f32[16,32], index: 0, kind: input, shape index: {}]   ;;  %s854_s1 = inlined_call_operand.vmem [shape: f32[32,32], index: 1, kind: input, shape index: {}]   ;;  %s855_s2 = inlined_call_operand.vmem [shape: f32[1,32], index: 2, kind: input, shape index: {}]   ;;  %s856_s3 = inlined_call_operand.hbm [shape: f32[32,38], index: 3, kind: input, shape index: {}]   ;;  %s857_s4 = inlined_call_operand.vmem [shape: f32[1,38], index: 4, kind: input, shape index: {}]   ;;  %s858_s5 = inlined_call_operand.vmem [shape: f32[32,1], index: 5, kind: input, shape index: {}]   ;;  %s859_s6 = inlined_call_operand.<no memory space> [shape: f32[1,1], index: 6, kind: input, shape index: {}]   ;;  %s860_s7 = inlined_call_operand.vmem [shape: f32[16,7], index: 7, kind: output, shape index: {}]  }
   0x1   :  { %v12_v0 = vstv %s859_s6 }
   0x2   :  { %13 = vst [vmem:[#allocation2] sm:$0x1] %v12_v0 }
   0x3   :  { %14 = vsyncpa [#allocation4], 0 }
   0x4   :  { %16 = vsyncpa [#allocation4 + $0x1], 0 }
   0x5   :  { %17 = vsyncpa [#allocation6], 0  ;;  %s717_s26 = smov 0   ;;  %s719_s27 = smov 0  }
   0x6   :  { %s721_s28 = smov 0   ;;  %s723_s29 = smov 0  }
   0x7 LB: > { %s223_s8 = sshll.u32 %s856_s3, 4  ;;  %s739_s9 = sadd.s32 4294967295, %s667_s29   ;;  %s667_s29 = sphi %s723_s29, %s867_s29   ;;  %s663_s28 = sphi %s721_s28, %s866_s28   ;;  %s659_s27 = sphi %s719_s27, %s865_s27   ;;  %s655_s26 = sphi %s717_s26, %s864_s26   ;;  %s224_s8 = int_to_ptr.hbm [resolvable:$true] %s223_s8 }
   0x8   : > { %p498_p0 = scmp.ge.s32.totalorder %s667_s29, 1  ;;  %p44_p1 = scmp.eq.s32.totalorder %s739_s9, 0 }
   0x9   : > { %p206_p2 = scmp.lt.s32.totalorder %s667_s29, 3  ;;  %s669_s11 = smov [#allocation5]  }
   0xa   : > { %s225_s12 = sshll.u32 %s669_s11, 4  ;;  %s670_s13 = smov 128   ;;  %s226_s12 = int_to_ptr.vmem [resolvable:$true] %s225_s12 }
   0xb   : > { %p744_p3 = pnand %p498_p0, %p206_p2  ;;  %s671_s14 = smov 8  }
   0xc   : > { %s753_s15 = sadd.s32 1, %s667_s29   ;;  %s30_s17 = sadd.s32 1, %s663_s28 }
   0xd   : > { %p518_p4 = pneg %p744_p3  ;;  %s27_s16 = ssub.s32 %s667_s29, %s753_s15 }
   0xe   : > { %p28_p6 = scmp.eq.s32.totalorder %s27_s16, 0  ;;  %p37_p7 = scmp.ne.s32.totalorder %s663_s28, %s659_s27 }
   0xf   : > { %p519_p5 = pnand %p518_p4, %p44_p1  ;;  %p38_p8 = scmp.eq.s32.totalorder %s667_s29, 0 }
  0x10   : > { %p43_p9 = scmp.ne.s32.totalorder %s659_s27, %s655_s26  ;;  %p527_p12 = scmp.lt.s32.totalorder %s667_s29, 2 }
  0x11   : > { %521 = dma.hbm_to_vmem [thread:$0]  (!%p519_p5), %s224_s8, 512, %s226_s12, [#allocation6], %s670_s13, %s670_s13, %s671_s14  }
  0x12   : > { %s763_s18 = scalar_select %p28_p6, %s663_s28, %s30_s17  }
  0x13   : > { %p39_p10 = por %p38_p8, %p37_p7  ;;  %p767_p11 = por %p44_p1, %p43_p9 }
  0x14   : > { %s248_s20 = sand.u32 1, %s663_s28   ;;  %s502_s22 = sshll.u32 %s667_s29, 3 }
  0x15   : > { %s501_s21 = sshll.u32 %s248_s20, 3  ;;  %s256_s25 = scalar_lea.hbm %s853_s0, %s502_s22 }
  0x16   : > { %s252_s6 = scalar_lea.vmem [#allocation3], %s501_s21  ;;  %s258_s8 = sshll.u32 %s256_s25, 4  ;;  %s259_s8 = int_to_ptr.hbm [resolvable:$true] %s258_s8 }
  0x17   : > { %s260_s30 = sshll.u32 %s252_s6, 4  ;;  %p777_p13 = pnand %p527_p12, %p39_p10  ;;  %s261_s30 = int_to_ptr.vmem [resolvable:$true] %s260_s30 }
  0x18   : > { %s249_s11 = scalar_lea.sflag [#allocation4], %s248_s20  ;;  %s599_s12 = sshra.s32 %s259_s8, 4  ;;  %s600_s12 = int_to_ptr.hbm [resolvable:$true] %s599_s12 }
  0x19   : > { %s601_s13 = scalar_lea.hbm %s600_s12, 8  ;;  %p603_p2 = pneg %p777_p13 }
  0x1a   : > { %p602_p0 = scmp.ne.s32.totalorder %s600_s12, %s601_s13  ;;  %s606_s16 = scalar_lea.hbm %s853_s0, 16 }
  0x1b   : > { %p607_p6 = scmp.lt.s32.totalorder %s600_s12, %s853_s0  ;;  %p608_p7 = scmp.lt.s32.totalorder %s606_s16, %s601_s13 }
  0x1c   : > { %p604_p4 = pnand %p603_p2, %p602_p0 }
  0x1d   : > { %p609_p8 = por %p608_p7, %p607_p6 }
  0x1e   : > { %p605_p5 = pneg %p604_p4 }
  0x20   : > { %p610_p9 = pnand %p609_p8, %p605_p5 }
  0x22   : > { %613 = shalt.err (!%p610_p9)
}
  0x23   : > { %525 = dma.hbm_to_vmem [thread:$0]  (!%p777_p13), %s259_s8, 128, %s261_s30, %s249_s11  }
  0x24   : > { %269 = sbr.rel (%p744_p3) target bundleno = 678 (0x2a6), region = 48  ;;  %s271_s20 = sand.u32 (!%p744_p3), 1, %s659_s27  }
  0x25   : > { %s504_s22 = sshll.u32 (!%p744_p3), %s271_s20, 3  ;;  %s272_s23 = scalar_lea.sflag (!%p744_p3), [#allocation4], %s271_s20 }
  0x26   : > { %s275_s24 = scalar_lea.vmem (!%p744_p3), [#allocation3], %s504_s22 }
  0x29   : > { %646 = dma.done.wait (%p767_p11), %s272_s23, 128  }
  0x2a   : > { %648 = vsyncadd (%p767_p11), %s272_s23, 4294967168 }
  0x2b   : > { %650 = dma.done.wait (%p44_p1), [#allocation6], 512  }
  0x2c   : > { %652 = vsyncadd (%p44_p1), [#allocation6], 4294966784  ;;  %v319_v1 = vld [vmem:[%s854_s1 + $0x18] sm:$0xff]  ;;  %v318_v2 = vld [vmem:[%s854_s1 + $0x10] sm:$0xff]  ;;  %vm324_vm0 = vcmask 261120   ;;  %s672_s10 = smov 122  }
  0x2d   : > { %340 = vmatpush.msra.mxu0 %v319_v1  ;;  %v352_v3 = vld [vmem:[#allocation5 + $0x18] sm:$0xff]  ;;  %v316_v5 = vld [vmem:[%s854_s1] sm:$0xff]  ;;  %v349_v9 = vld [vmem:[#allocation5] sm:$0xff]  ;;  %s673_s6 = smov 6   ;;  %p311_p1 = scmp.lt.s32.totalorder %s739_s9, 1  ;;  %vm418_vm1 = vcmask 48128  }
  0x2e   : > { %v317_v4 = vld [vmem:[%s854_s1 + $0x8] sm:$0xff]  ;;  %372 = vmatpush.msra.mxu1 %v352_v3  ;;  %v350_v8 = vld [vmem:[#allocation5 + $0x8] sm:$0xff]  ;;  %v383_v15 = vld [vmem:[%s858_s5 + $0x10] sm:$0xff]  ;;  %vm420_vm2 = vcmask 56320  }
  0x2f   : > { %341 = vmatpush.msra.mxu0 %v318_v2  ;;  %v315_v6 = vld [vmem:[%s275_s24] sm:$0xff]  ;;  %v566_v10 = vld [vmem:[%s855_s2] ss:$0 sm:$0xff]  ;;  %v384_v14 = vld [vmem:[%s858_s5 + $0x18] sm:$0xff]  ;;  %s869_s9 = smov (!%p311_p1, %s739_s9), 1 }
  0x30   : > { %v351_v7 = vld [vmem:[#allocation5 + $0x10] sm:$0xff]  ;;  %406 = vmatpush.msra.mxu2 %v384_v14  ;;  %v567_v18 = vld [vmem:[%s857_s4] ss:$0 sm:$0xff]  ;;  %s506_s30 = sshll.u32 %s869_s9, 3 }
  0x31   : > { %342 = vmatpush.msra.mxu0 %v317_v4  ;;  %373 = vmatpush.msra.mxu1 %v351_v7  ;;  %v382_v16 = vld [vmem:[%s858_s5 + $0x8] sm:$0xff]  ;;  %v381_v17 = vld [vmem:[%s858_s5] sm:$0xff]  ;;  %s314_s19 = scalar_lea.vmem %s860_s7, %s506_s30 }
  0x32   : > { %407 = vmatpush.msra.mxu2 %v383_v15  ;;  %v568_v23 = vld [vmem:[#allocation2] ss:$0 sm:$0xff] }
  0x33   : > { %343 = vmatpush.msra.mxu0 %v316_v5  ;;  %374 = vmatpush.msra.mxu1 %v350_v8 }
  0x34   : > { %507 = vmatmul.msk.f32.vlgmr.msra.gmra.mxu0 %vm324_vm0, %v315_v6  ;;  %408 = vmatpush.msra.mxu2 %v382_v16 }
  0x35   : > { %375 = vmatpush.msra.mxu1 %v349_v9 }
  0x36   : > { %409 = vmatpush.msra.mxu2 %v381_v17 }
  0xb1   : > { %v345_v11 = vpop.f32.mrf.mxu0 }
  0xb2   : > { %v346_v12 = vadd.f32 %v566_v10, %v345_v11 }
  0xb4   : > { %v348_v13 = vmax.f32 %v346_v12, 0.0 }
  0xb6   : > { %508 = vmatmul.msk.f32.vlgmr.msra.gmra.mxu1 %vm324_vm0, %v348_v13 }
 0x133   : > { %v377_v19 = vpop.f32.mrf.mxu1 }
 0x134   : > { %v378_v20 = vadd.f32 %v567_v18, %v377_v19 }
 0x136   : > { %v380_v21 = vmax.f32 %v378_v20, 0.0 }
 0x138   : > { %390 = vrot.lane.b32.xlu0 %v380_v21, %s672_s10 }
 0x1aa   : > { %v391_v22 = vpop.permute.xlu0 %390 }
 0x1ab   : > { %509 = vmatmul.msk.f32.vlgmr.msra.gmra.mxu2 %vm324_vm0, %v391_v22 }
 0x22e   : > { %v411_v24 = vpop.f32.mrf.mxu2 }
 0x22f   : > { %v412_v25 = vadd.f32 %v568_v23, %v411_v24 }
 0x231   : > { %415 = vrot.lane.b32.xlu0 %v412_v25, %s673_s6 }
 0x2a3   : > { %v416_v26 = vpop.permute.xlu0 %415 }
 0x2a4   : > { %v419_v27 = vsel %vm418_vm1, %v378_v20, %v416_v26 }
 0x2a5   : > { %421 = vst.msk [vmem:[%s314_s19] sm:$0xff] %vm420_vm2, %v419_v27 }
 0x2a6 PF: > { %p20_p3 = scmp.ge.s32.totalorder %s753_s15, 4   ;;  %s864_s26 = smov %s659_s27 }
 0x2a7   : > { %s865_s27 = smov %s663_s28  ;;  %s866_s28 = smov %s763_s18 }
 0x2a8   : > { %s867_s29 = smov %s753_s15  ;;  %22 = sbr.rel (!%p20_p3) target bundleno = 7 (0x7), region = 92 }
 0x2ad   :  { %441 = vsyncpa [#allocation4], 1 }
 0x2ae   :  { %443 = vsyncpa [#allocation4 + $0x1], 1 }
 0x2af   :  { %444 = vsyncpa [#allocation6], 1 }

</bundles_post_ra>
